<compile_context>
chip_gen: v7x
topology: tpu7x:2x2x1
jax: 0.10.0
libtpu: 0.0.40
codegen_flags: <defaults>
</compile_context>

<pallas_src>
import functools

import jax
import jax.numpy as jnp
from jax.experimental import pallas as pl
from jax.experimental.pallas import tpu as pltpu

IN_FEATURES = 32 * 32   # 1024
OUT_FEATURES = 128


def _encoder_kernel(x_ref, w_ref, b_ref, o_ref):
    # x_ref: [TB, K], w_ref: [K, N], b_ref: [1, N], o_ref: [TB, N]
    y = jnp.dot(x_ref[...], w_ref[...], preferred_element_type=jnp.float32)
    y = y + b_ref[...].astype(jnp.float32)
    o_ref[...] = jnp.maximum(y, 0.0).astype(o_ref.dtype)


def prepare_params(weight, bias, compute_dtype=jnp.float32):
    """Hoist layout / dtype work out of the per-call path.

    weight: [128, 1024] (PyTorch layout), bias: [128]
    Returns (w_t, b2) = ([1024, 128] in compute_dtype, [1, 128] f32).
    """
    w_t = jnp.asarray(weight).T.astype(compute_dtype)              # [K, N]
    b2 = jnp.asarray(bias).reshape(1, OUT_FEATURES).astype(jnp.float32)
    return w_t, b2


@functools.partial(jax.jit, static_argnames=("tb_max",))
def encoder_rand_forward(x, w_t, b2, *, tb_max=1024):
    """x: [B, C, H, W] with C*H*W == 1024; w_t: [1024, 128]; b2: [1, 128]."""
    B = x.shape[0]
    x_flat = x.reshape(B, IN_FEATURES).astype(w_t.dtype)            # [B, K]

    if B <= tb_max:
        # Single block covering the full batch (legal even if B % 8 != 0,
        # since the block equals the full array extent).
        tb = B
        b_padded = B
    else:
        tb = tb_max
        b_padded = ((B + tb - 1) // tb) * tb
        if b_padded != B:
            x_flat = jnp.pad(x_flat, ((0, b_padded - B), (0, 0)))

    grid = (b_padded // tb,)

    flops = 2 * b_padded * IN_FEATURES * OUT_FEATURES
    bytes_accessed = (
        x_flat.size * x_flat.dtype.itemsize
        + w_t.size * w_t.dtype.itemsize
        + b2.size * b2.dtype.itemsize
        + b_padded * OUT_FEATURES * 4
    )

    out = pl.pallas_call(
        _encoder_kernel,
        out_shape=jax.ShapeDtypeStruct((b_padded, OUT_FEATURES), jnp.float32),
        grid=grid,
        in_specs=[
            # x tile marches along the batch; weight/bias stay resident.
            pl.BlockSpec((tb, IN_FEATURES), lambda i: (i, 0)),
            pl.BlockSpec((IN_FEATURES, OUT_FEATURES), lambda i: (0, 0)),
            pl.BlockSpec((1, OUT_FEATURES), lambda i: (0, 0)),
        ],
        out_specs=pl.BlockSpec((tb, OUT_FEATURES), lambda i: (i, 0)),
        compiler_params=pltpu.CompilerParams(
            dimension_semantics=("parallel",)),
        cost_estimate=pl.CostEstimate(
            flops=flops, transcendentals=0, bytes_accessed=bytes_accessed),
    )(x_flat, w_t, b2)

    if b_padded != B:
        out = out[:B]

    # Mirror the PyTorch .detach(): no gradient flows through z.
    return jax.lax.stop_gradient(out)


def init_params(key):
    """Deterministic init matching the PyTorch module:
       weight ~ kaiming_normal_(nonlinearity='relu')  (std = sqrt(2 / fan_in))
       bias   = 0
    """
    fan_in = IN_FEATURES
    std = jnp.sqrt(2.0 / fan_in)
    w = jax.random.normal(key, (OUT_FEATURES, IN_FEATURES), jnp.float32) * std
    b = jnp.zeros((OUT_FEATURES,), jnp.float32)
    return w, b


if __name__ == "__main__":
    key = jax.random.PRNGKey(0)
    k_w, k_x = jax.random.split(key)

    weight, bias = init_params(k_w)
    # Transpose / reshape / cast done ONCE, outside the per-call hot path.
    w_t, b2 = prepare_params(weight, bias, compute_dtype=jnp.float32)

    # Small input consistent with the module: flatten(x, 1) must have 1024 elems.
    B = 2
    x = jax.random.normal(k_x, (B, 1, 32, 32), jnp.float32)  # NCHW

    z = encoder_rand_forward(x, w_t, b2)
    z = jax.block_until_ready(z)

    # Reference check in plain JAX (same math as the PyTorch forward).
    z_ref = jnp.maximum(x.reshape(B, -1) @ weight.T + bias, 0.0)
    assert z.shape == (B, OUT_FEATURES)
    assert jnp.allclose(z, z_ref, atol=1e-5, rtol=1e-5)

    # Also exercise the multi-tile path (B > tb_max) to validate tiling/padding.
    B2 = 20
    x2 = jax.random.normal(k_x, (B2, 1, 32, 32), jnp.float32)
    z2 = jax.block_until_ready(encoder_rand_forward(x2, w_t, b2, tb_max=8))
    z2_ref = jnp.maximum(x2.reshape(B2, -1) @ weight.T + bias, 0.0)
    assert jnp.allclose(z2, z2_ref, atol=1e-5, rtol=1e-5)

    print("KERNEL_OK")
</pallas_src>

<mosaic_0001>
module attributes {stable_mosaic.version = 11 : i64} {
  func.func @_encoder_kernel(%arg0: i32, %arg1: memref<2x1024xf32, #tpu.memory_space<vmem>>, %arg2: memref<1024x128xf32, #tpu.memory_space<vmem>>, %arg3: memref<1x128xf32, #tpu.memory_space<vmem>>, %arg4: memref<2x128xf32, #tpu.memory_space<vmem>>) attributes {dimension_semantics = [#tpu.dimension_semantics<parallel>], iteration_bounds = array<i64: 1>, scalar_prefetch = 0 : i64, scratch_operands = 0 : i64, tpu.core_type = #tpu.core_type<tc>, window_params = [{transform_indices = @transform_0, window_bounds = array<i64: 2, 1024>}, {pipeline_mode = #tpu.pipeline_mode<synchronous>, transform_indices = @transform_1, window_bounds = array<i64: 1024, 128>}, {pipeline_mode = #tpu.pipeline_mode<synchronous>, transform_indices = @transform_2, window_bounds = array<i64: 1, 128>}, {transform_indices = @transform_3, window_bounds = array<i64: 2, 128>}]} {
    %c0 = arith.constant 0 : index
    %c0_0 = arith.constant 0 : index
    %0 = vector.load %arg1[%c0, %c0_0] : memref<2x1024xf32, #tpu.memory_space<vmem>>, vector<2x1024xf32>
    %c0_1 = arith.constant 0 : index
    %c0_2 = arith.constant 0 : index
    %1 = vector.load %arg2[%c0_1, %c0_2] : memref<1024x128xf32, #tpu.memory_space<vmem>>, vector<1024x128xf32>
    %cst = arith.constant dense<0.000000e+00> : vector<2x128xf32>
    %2 = tpu.matmul %0, %1, %cst {dimension_numbers = #tpu.dot_dimension_numbers<[1], [0], [0], [1], [0, 0, 1, 1], [], []>} : vector<2x1024xf32>, vector<1024x128xf32>, vector<2x128xf32> -> vector<2x128xf32>
    %c0_3 = arith.constant 0 : index
    %c0_4 = arith.constant 0 : index
    %3 = vector.load %arg3[%c0_3, %c0_4] : memref<1x128xf32, #tpu.memory_space<vmem>>, vector<1x128xf32>
    %4 = vector.broadcast %3 : vector<1x128xf32> to vector<2x128xf32>
    %5 = arith.addf %2, %4 : vector<2x128xf32>
    %cst_5 = arith.constant 0.000000e+00 : f32
    %6 = vector.broadcast %cst_5 : f32 to vector<2x128xf32>
    %7 = arith.maximumf %5, %6 : vector<2x128xf32>
    %c0_6 = arith.constant 0 : index
    %c0_7 = arith.constant 0 : index
    %8 = vector.load %arg4[%c0_6, %c0_7] : memref<2x128xf32, #tpu.memory_space<vmem>>, vector<2x128xf32>
    tpu.vector_store %arg4[%c0_6, %c0_7], %7 {strides = array<i32>} : memref<2x128xf32, #tpu.memory_space<vmem>>, vector<2x128xf32>,
    return
  }
  func.func @transform_0(%arg0: i32) -> (i32, i32) {
    %c0_i32 = arith.constant 0 : i32
    %c0_i32_0 = arith.constant 0 : i32
    return %arg0, %c0_i32 : i32, i32
  }
  func.func @transform_1(%arg0: i32) -> (i32, i32) {
    %c0_i32 = arith.constant 0 : i32
    %c0_i32_0 = arith.constant 0 : i32
    %c0_i32_1 = arith.constant 0 : i32
    return %c0_i32, %c0_i32_0 : i32, i32
  }
  func.func @transform_2(%arg0: i32) -> (i32, i32) {
    %c0_i32 = arith.constant 0 : i32
    %c0_i32_0 = arith.constant 0 : i32
    %c0_i32_1 = arith.constant 0 : i32
    return %c0_i32, %c0_i32_0 : i32, i32
  }
  func.func @transform_3(%arg0: i32) -> (i32, i32) {
    %c0_i32 = arith.constant 0 : i32
    %c0_i32_0 = arith.constant 0 : i32
    return %arg0, %c0_i32 : i32, i32
  }
}

</mosaic_0001>

<bundles_post_ra>
// kernel: encoder_rand_forward.1
= control target key start
LH: loop header
LB: loop body
LE: loop exit
PB: predicated region body
PF: predicated region fallthrough
CT: control target
= control target key end

     0   :  { %8 = vsyncpa [#allocation3], 0  ;;  %s900_s0 = inlined_call_operand.vmem [shape: f32[2,1024], index: 0, kind: input, shape index: {}]   ;;  %s901_s1 = inlined_call_operand.hbm [shape: f32[1024,128], index: 1, kind: input, shape index: {}]   ;;  %s902_s2 = inlined_call_operand.vmem [shape: f32[1,128], index: 2, kind: input, shape index: {}]   ;;  %s903_s3 = inlined_call_operand.hbm [shape: f32[2,128], index: 3, kind: output, shape index: {}]  }
   0x1   :  { %9 = vsyncpa [#allocation4], 0  ;;  %s831_s12 = smov [#allocation2]   ;;  %s783_s16 = scalar_lea.hbm %s901_s1, 16384 }
   0x2   :  { %s17_s13 = sshll.u32 %s831_s12, 4  ;;  %p784_p0 = scmp.ne.s32.totalorder %s901_s1, %s783_s16  ;;  %s18_s13 = int_to_ptr.vmem [resolvable:$true] %s17_s13 }
   0x3   :  { %p787_p1 = scmp.lt.u32.totalorder %s783_s16, %s901_s1 }
   0x5   :  { %p789_p2 = pnand %p787_p1, %p784_p0 }
   0x7   :  { %792 = shalt.err (!%p789_p2)
}
   0x8   :  { %s793_s21 = scalar_lea.vmem %s18_s13, 16384  ;;  %p798_p4 = scmp.lt.s32.totalorder %s18_s13, %s18_s13 }
   0x9   :  { %p794_p3 = scmp.ne.s32.totalorder %s18_s13, %s793_s21  ;;  %p799_p5 = scmp.lt.s32.totalorder %s793_s21, %s793_s21 }
   0xb   :  { %p800_p6 = por %p799_p5, %p798_p4 }
   0xd   :  { %p801_p7 = pnand %p800_p6, %p794_p3 }
   0xf   :  { %804 = shalt.err (!%p801_p7)
}
  0x10   :  { %s832_s22 = smov 128   ;;  %s833_s23 = smov 8  }
  0x11   :  { %23 = dma.hbm_to_vmem [thread:$0]  %s901_s1, 16384, %s18_s13, [#allocation3], %s832_s22, %s832_s22, %s833_s23  }
  0x12   :  { %827 = dma.done.wait [#allocation3], 16384  }
  0x13   :  { %828 = vsyncadd [#allocation3], 4294950912  ;;  %v47_v0 = vld [vmem:[#allocation2 + $0x80] sm:$0xff]  ;;  %v48_v1 = vld [vmem:[#allocation2 + $0x88] sm:$0xff]  ;;  %v834_v47 = vmov 1983009808   ;;  %v172_v49 = vlaneseq }
  0x14   :  { %v31_v2 = vld [vmem:[#allocation2] sm:$0xff]  ;;  %v648_v3 = vpack.c.bf16 %v48_v1, %v47_v0  ;;  %v32_v4 = vld [vmem:[#allocation2 + $0x8] sm:$0xff]  ;;  %v49_v11 = vld [vmem:[#allocation2 + $0x90] sm:$0xff]  ;;  %v170_v48 = vunpack.c.l.s4 %v834_v47  ;;  %s835_s30 = smov [#allocation5]  }
  0x15   :  { %v79_v5 = vld [vmem:[#allocation2 + $0x180] sm:$0xff]  ;;  %v80_v6 = vld [vmem:[#allocation2 + $0x188] sm:$0xff]  ;;  %v650_v7 = vpack.c.bf16 %v32_v4, %v31_v2  ;;  %v50_v13 = vld [vmem:[#allocation2 + $0x98] sm:$0xff]  ;;  %v173_v0 = vshrl.u32 %v172_v49, 7  ;;  %s498_s4 = sshll.u32 %s835_s30, 4  ;;  %s499_s4 = int_to_ptr.vmem [resolvable:$true] %s498_s4 }
  0x16   :  { %v680_v8 = vpack.c.bf16 %v80_v6, %v79_v5  ;;  %v63_v9 = vld [vmem:[#allocation2 + $0x100] sm:$0xff]  ;;  %v64_v10 = vld [vmem:[#allocation2 + $0x108] sm:$0xff]  ;;  %649 = vmatprep.subr.bf16.mxu0 %v648_v3  ;;  %v33_v14 = vld [vmem:[#allocation2 + $0x10] sm:$0xff]  ;;  %v652_v16 = vpack.c.bf16 %v50_v13, %v49_v11  ;;  %v171_v63 = vunpack.c.0.s8 %v170_v48  ;;  %p810_p9 = scmp.lt.s32.totalorder %s499_s4, %s499_s4 }
  0x17   :  { %v682_v12 = vpack.c.bf16 %v64_v10, %v63_v9  ;;  %v34_v15 = vld [vmem:[#allocation2 + $0x18] sm:$0xff]  ;;  %651 = vmatpush3.bf16.msra.mxu0 %v650_v7  ;;  %v81_v18 = vld [vmem:[#allocation2 + $0x190] sm:$0xff]  ;;  %v51_v23 = vld [vmem:[#allocation2 + $0xa0] sm:$0xff] }
  0x18   :  { %681 = vmatprep.subr.bf16.mxu1 %v680_v8  ;;  %v654_v17 = vpack.c.bf16 %v34_v15, %v33_v14  ;;  %v82_v19 = vld [vmem:[#allocation2 + $0x198] sm:$0xff]  ;;  %v65_v20 = vld [vmem:[#allocation2 + $0x110] sm:$0xff]  ;;  %v52_v24 = vld [vmem:[#allocation2 + $0xa8] sm:$0xff]  ;;  %653 = vmatprep.subr.bf16.mxu0 %v652_v16  ;;  %v868_v13 = vsub.s32 %v171_v63, %v173_v0 }
  0x19   :  { %683 = vmatpush3.bf16.msra.mxu1 %v682_v12  ;;  %v684_v21 = vpack.c.bf16 %v82_v19, %v81_v18  ;;  %v66_v22 = vld [vmem:[#allocation2 + $0x118] sm:$0xff]  ;;  %v656_v26 = vpack.c.bf16 %v52_v24, %v51_v23  ;;  %v35_v27 = vld [vmem:[#allocation2 + $0x20] sm:$0xff]  ;;  %v36_v28 = vld [vmem:[#allocation2 + $0x28] sm:$0xff] }
  0x1a   :  { %v686_v25 = vpack.c.bf16 %v66_v22, %v65_v20  ;;  %v83_v29 = vld [vmem:[#allocation2 + $0x1a0] sm:$0xff]  ;;  %v84_v30 = vld [vmem:[#allocation2 + $0x1a8] sm:$0xff]  ;;  %v658_v33 = vpack.c.bf16 %v36_v28, %v35_v27  ;;  %v53_v35 = vld [vmem:[#allocation2 + $0xb0] sm:$0xff] }
  0x1b   :  { %685 = vmatprep.subr.bf16.mxu1 %v684_v21  ;;  %v67_v31 = vld [vmem:[#allocation2 + $0x120] sm:$0xff]  ;;  %v68_v32 = vld [vmem:[#allocation2 + $0x128] sm:$0xff]  ;;  %655 = vmatpush3.bf16.msra.mxu0 %v654_v17  ;;  %v688_v34 = vpack.c.bf16 %v84_v30, %v83_v29  ;;  %v54_v36 = vld [vmem:[#allocation2 + $0xb8] sm:$0xff] }
  0x1c   :  { %v37_v37 = vld [vmem:[#allocation2 + $0x30] sm:$0xff]  ;;  %657 = vmatprep.subr.bf16.mxu0 %v656_v26  ;;  %v690_v38 = vpack.c.bf16 %v68_v32, %v67_v31  ;;  %v660_v39 = vpack.c.bf16 %v54_v36, %v53_v35  ;;  %v38_v40 = vld [vmem:[#allocation2 + $0x38] sm:$0xff]  ;;  %v55_v46 = vld [vmem:[#allocation2 + $0xc0] sm:$0xff] }
  0x1d   :  { %687 = vmatpush3.bf16.msra.mxu1 %v686_v25  ;;  %v85_v41 = vld [vmem:[#allocation2 + $0x1b0] sm:$0xff]  ;;  %v86_v42 = vld [vmem:[#allocation2 + $0x1b8] sm:$0xff]  ;;  %v56_v50 = vld [vmem:[#allocation2 + $0xc8] sm:$0xff]  ;;  %v662_v51 = vpack.c.bf16 %v38_v40, %v37_v37 }
  0x1e   :  { %689 = vmatprep.subr.bf16.mxu1 %v688_v34  ;;  %v692_v43 = vpack.c.bf16 %v86_v42, %v85_v41  ;;  %v69_v44 = vld [vmem:[#allocation2 + $0x130] sm:$0xff]  ;;  %v70_v45 = vld [vmem:[#allocation2 + $0x138] sm:$0xff]  ;;  %v87_v52 = vld [vmem:[#allocation2 + $0x1c0] sm:$0xff]  ;;  %v664_v55 = vpack.c.bf16 %v56_v50, %v55_v46 }
  0x1f   :  { %659 = vmatpush3.bf16.msra.mxu0 %v658_v33  ;;  %v88_v53 = vld [vmem:[#allocation2 + $0x1c8] sm:$0xff]  ;;  %v694_v54 = vpack.c.bf16 %v70_v45, %v69_v44  ;;  %v39_v56 = vld [vmem:[#allocation2 + $0x40] sm:$0xff]  ;;  %v57_v61 = vld [vmem:[#allocation2 + $0xd0] sm:$0xff] }
  0x20   :  { %661 = vmatprep.subr.bf16.mxu0 %v660_v39  ;;  %v40_v57 = vld [vmem:[#allocation2 + $0x48] sm:$0xff]  ;;  %v71_v58 = vld [vmem:[#allocation2 + $0x140] sm:$0xff]  ;;  %v696_v59 = vpack.c.bf16 %v88_v53, %v87_v52  ;;  %v58_v62 = vld [vmem:[#allocation2 + $0xd8] sm:$0xff] }
  0x21   :  { %691 = vmatpush3.bf16.msra.mxu1 %v690_v38  ;;  %v72_v60 = vld [vmem:[#allocation2 + $0x148] sm:$0xff]  ;;  %v89_v1 = vld [vmem:[#allocation2 + $0x1d0] sm:$0xff]  ;;  %v90_v2 = vld [vmem:[#allocation2 + $0x1d8] sm:$0xff]  ;;  %v666_v3 = vpack.c.bf16 %v40_v57, %v39_v56  ;;  %v668_v5 = vpack.c.bf16 %v58_v62, %v57_v61 }
  0x22   :  { %693 = vmatprep.subr.bf16.mxu1 %v692_v43  ;;  %v698_v4 = vpack.c.bf16 %v72_v60, %v71_v58  ;;  %v41_v6 = vld [vmem:[#allocation2 + $0x50] sm:$0xff]  ;;  %v42_v7 = vld [vmem:[#allocation2 + $0x58] sm:$0xff]  ;;  %v700_v9 = vpack.c.bf16 %v90_v2, %v89_v1  ;;  %v59_v11 = vld [vmem:[#allocation2 + $0xe0] sm:$0xff] }
  0x23   :  { %663 = vmatpush3.bf16.msra.mxu0 %v662_v51  ;;  %v73_v8 = vld [vmem:[#allocation2 + $0x150] sm:$0xff]  ;;  %v74_v10 = vld [vmem:[#allocation2 + $0x158] sm:$0xff]  ;;  %v60_v12 = vld [vmem:[#allocation2 + $0xe8] sm:$0xff]  ;;  %v670_v16 = vpack.c.bf16 %v42_v7, %v41_v6 }
  0x24   :  { %665 = vmatprep.subr.bf16.mxu0 %v664_v55  ;;  %v91_v14 = vld [vmem:[#allocation2 + $0x1e0] sm:$0xff]  ;;  %v92_v15 = vld [vmem:[#allocation2 + $0x1e8] sm:$0xff]  ;;  %v702_v18 = vpack.c.bf16 %v74_v10, %v73_v8  ;;  %v672_v19 = vpack.c.bf16 %v60_v12, %v59_v11  ;;  %v29_v22 = vld [vmem:[%s900_s0] sm:$0xff] }
  0x25   :  { %695 = vmatpush3.bf16.msra.mxu1 %v694_v54  ;;  %v43_v17 = vld [vmem:[#allocation2 + $0x60] sm:$0xff]  ;;  %v44_v20 = vld [vmem:[#allocation2 + $0x68] sm:$0xff]  ;;  %v704_v23 = vpack.c.bf16 %v92_v15, %v91_v14  ;;  %v61_v25 = vld [vmem:[#allocation2 + $0xf0] sm:$0xff]  ;;  %v175_v27 = vrot.slane %v29_v22, %v868_v13  ;;  %v168_v28 = vcombine.high %v29_v22, %v29_v22 }
  0x26   :  { %697 = vmatprep.subr.bf16.mxu1 %v696_v59  ;;  %v75_v21 = vld [vmem:[#allocation2 + $0x160] sm:$0xff]  ;;  %v76_v24 = vld [vmem:[#allocation2 + $0x168] sm:$0xff]  ;;  %v62_v26 = vld [vmem:[#allocation2 + $0xf8] sm:$0xff]  ;;  %v674_v31 = vpack.c.bf16 %v44_v20, %v43_v17 }
  0x27   :  { %667 = vmatpush3.bf16.msra.mxu0 %v666_v3  ;;  %v93_v29 = vld [vmem:[#allocation2 + $0x1f0] sm:$0xff]  ;;  %v94_v30 = vld [vmem:[#allocation2 + $0x1f8] sm:$0xff]  ;;  %v183_v32 = vcombine.high %v175_v27, %v175_v27  ;;  %v182_v33 = vrot.slane %v168_v28, %v868_v13  ;;  %v706_v34 = vpack.c.bf16 %v76_v24, %v75_v21  ;;  %v676_v35 = vpack.c.bf16 %v62_v26, %v61_v25  ;;  %v111_v41 = vld [vmem:[#allocation2 + $0x280] sm:$0xff] }
  0x28   :  { %669 = vmatprep.subr.bf16.mxu0 %v668_v5  ;;  %v45_v36 = vld [vmem:[#allocation2 + $0x70] sm:$0xff]  ;;  %v46_v37 = vld [vmem:[#allocation2 + $0x78] sm:$0xff]  ;;  %v708_v39 = vpack.c.bf16 %v94_v30, %v93_v29  ;;  %v112_v42 = vld [vmem:[#allocation2 + $0x288] sm:$0xff] }
  0x29   :  { %699 = vmatpush3.bf16.msra.mxu1 %v698_v4  ;;  %v77_v38 = vld [vmem:[#allocation2 + $0x170] sm:$0xff]  ;;  %v78_v40 = vld [vmem:[#allocation2 + $0x178] sm:$0xff]  ;;  %274 = vmatprep.mubr.f32.mxu0 %v183_v32  ;;  %v184_v43 = vcombine.high %v182_v33, %v182_v33  ;;  %v143_v44 = vld [vmem:[#allocation2 + $0x380] sm:$0xff]  ;;  %v678_v46 = vpack.c.bf16 %v46_v37, %v45_v36  ;;  %v712_v48 = vpack.c.bf16 %v112_v42, %v111_v41 }
  0x2a   :  { %701 = vmatprep.subr.bf16.mxu1 %v700_v9  ;;  %v144_v45 = vld [vmem:[#allocation2 + $0x388] sm:$0xff]  ;;  %v710_v47 = vpack.c.bf16 %v78_v40, %v77_v38  ;;  %v95_v49 = vld [vmem:[#allocation2 + $0x200] sm:$0xff]  ;;  %v113_v54 = vld [vmem:[#allocation2 + $0x290] sm:$0xff] }
  0x2b   :  { %671 = vmatpush3.bf16.msra.mxu0 %v670_v16  ;;  %344 = vmatprep.mubr.f32.mxu1 %v184_v43  ;;  %v96_v50 = vld [vmem:[#allocation2 + $0x208] sm:$0xff]  ;;  %v127_v51 = vld [vmem:[#allocation2 + $0x300] sm:$0xff]  ;;  %v744_v52 = vpack.c.bf16 %v144_v45, %v143_v44  ;;  %v114_v55 = vld [vmem:[#allocation2 + $0x298] sm:$0xff] }
  0x2c   :  { %673 = vmatprep.subr.bf16.mxu0 %v672_v19  ;;  %v128_v53 = vld [vmem:[#allocation2 + $0x308] sm:$0xff]  ;;  %v145_v56 = vld [vmem:[#allocation2 + $0x390] sm:$0xff]  ;;  %v146_v57 = vld [vmem:[#allocation2 + $0x398] sm:$0xff]  ;;  %v714_v58 = vpack.c.bf16 %v96_v50, %v95_v49  ;;  %v716_v60 = vpack.c.bf16 %v114_v55, %v113_v54 }
  0x2d   :  { %703 = vmatpush3.bf16.msra.mxu1 %v702_v18  ;;  %v746_v59 = vpack.c.bf16 %v128_v53, %v127_v51  ;;  %v97_v61 = vld [vmem:[#allocation2 + $0x210] sm:$0xff]  ;;  %v98_v62 = vld [vmem:[#allocation2 + $0x218] sm:$0xff]  ;;  %v748_v0 = vpack.c.bf16 %v146_v57, %v145_v56  ;;  %v115_v2 = vld [vmem:[#allocation2 + $0x2a0] sm:$0xff] }
  0x2e   :  { %705 = vmatprep.subr.bf16.mxu1 %v704_v23  ;;  %v129_v63 = vld [vmem:[#allocation2 + $0x310] sm:$0xff]  ;;  %v130_v1 = vld [vmem:[#allocation2 + $0x318] sm:$0xff]  ;;  %v116_v3 = vld [vmem:[#allocation2 + $0x2a8] sm:$0xff]  ;;  %v718_v6 = vpack.c.bf16 %v98_v62, %v97_v61 }
  0x2f   :  { %675 = vmatpush3.bf16.msra.mxu0 %v674_v31  ;;  %v147_v4 = vld [vmem:[#allocation2 + $0x3a0] sm:$0xff]  ;;  %v148_v5 = vld [vmem:[#allocation2 + $0x3a8] sm:$0xff]  ;;  %v750_v7 = vpack.c.bf16 %v130_v1, %v129_v63  ;;  %v720_v8 = vpack.c.bf16 %v116_v3, %v115_v2  ;;  %v117_v15 = vld [vmem:[#allocation2 + $0x2b0] sm:$0xff] }
  0x30   :  { %677 = vmatprep.subr.bf16.mxu0 %v676_v35  ;;  %v99_v9 = vld [vmem:[#allocation2 + $0x220] sm:$0xff]  ;;  %v100_v10 = vld [vmem:[#allocation2 + $0x228] sm:$0xff]  ;;  %v752_v12 = vpack.c.bf16 %v148_v5, %v147_v4  ;;  %v118_v16 = vld [vmem:[#allocation2 + $0x2b8] sm:$0xff] }
  0x31   :  { %707 = vmatpush3.bf16.msra.mxu1 %v706_v34  ;;  %v131_v11 = vld [vmem:[#allocation2 + $0x320] sm:$0xff]  ;;  %v132_v14 = vld [vmem:[#allocation2 + $0x328] sm:$0xff]  ;;  %v149_v17 = vld [vmem:[#allocation2 + $0x3b0] sm:$0xff]  ;;  %v722_v19 = vpack.c.bf16 %v100_v10, %v99_v9  ;;  %v724_v21 = vpack.c.bf16 %v118_v16, %v117_v15 }
  0x32   :  { %709 = vmatprep.subr.bf16.mxu1 %v708_v39  ;;  %v150_v18 = vld [vmem:[#allocation2 + $0x3b8] sm:$0xff]  ;;  %v754_v20 = vpack.c.bf16 %v132_v14, %v131_v11  ;;  %v101_v22 = vld [vmem:[#allocation2 + $0x230] sm:$0xff]  ;;  %v120_v28 = vld [vmem:[#allocation2 + $0x2c8] sm:$0xff] }
  0x33   :  { %679 = vmatpush3.bf16.msra.mxu0 %v678_v46  ;;  %v102_v23 = vld [vmem:[#allocation2 + $0x238] sm:$0xff]  ;;  %v133_v24 = vld [vmem:[#allocation2 + $0x330] sm:$0xff]  ;;  %v756_v25 = vpack.c.bf16 %v150_v18, %v149_v17  ;;  %v151_v29 = vld [vmem:[#allocation2 + $0x3c0] sm:$0xff] }
  0x34   :  { %713 = vmatprep.subr.bf16.mxu0 %v712_v48  ;;  %v134_v26 = vld [vmem:[#allocation2 + $0x338] sm:$0xff]  ;;  %v152_v30 = vld [vmem:[#allocation2 + $0x3c8] sm:$0xff]  ;;  %v726_v32 = vpack.c.bf16 %v102_v23, %v101_v22  ;;  %v103_v37 = vld [vmem:[#allocation2 + $0x240] sm:$0xff] }
  0x35   :  { %711 = vmatpush3.bf16.msra.mxu1 %v710_v47  ;;  %v30_v31 = vld [vmem:[%s900_s0 + $0x8] sm:$0xff]  ;;  %v758_v35 = vpack.c.bf16 %v134_v26, %v133_v24  ;;  %v104_v38 = vld [vmem:[#allocation2 + $0x248] sm:$0xff]  ;;  %v135_v39 = vld [vmem:[#allocation2 + $0x340] sm:$0xff]  ;;  %v760_v40 = vpack.c.bf16 %v152_v30, %v151_v29 }
  0x36   :  { %745 = vmatprep.subr.bf16.mxu1 %v744_v52  ;;  %275 = vmatmul.mubr.f32.vlgmr.msra.gmra.mrb[0].mxu0 %v175_v27  ;;  %v119_v27 = vld [vmem:[#allocation2 + $0x2c0] sm:$0xff]  ;;  %v185_v34 = vcombine.high %v30_v31, %v30_v31  ;;  %v136_v41 = vld [vmem:[#allocation2 + $0x348] sm:$0xff]  ;;  %v121_v42 = vld [vmem:[#allocation2 + $0x2d0] sm:$0xff]  ;;  %v730_v48 = vpack.c.bf16 %v104_v38, %v103_v37 }
  0x37   :  { %715 = vmatpush3.bf16.msra.mxu0 %v714_v58  ;;  %v728_v36 = vpack.c.bf16 %v120_v28, %v119_v27  ;;  %v122_v43 = vld [vmem:[#allocation2 + $0x2d8] sm:$0xff]  ;;  %v153_v46 = vld [vmem:[#allocation2 + $0x3d0] sm:$0xff]  ;;  %v762_v50 = vpack.c.bf16 %v136_v41, %v135_v39  ;;  %v123_v57 = vld [vmem:[#allocation2 + $0x2e0] sm:$0xff] }
  0x38   :  { %345 = vmatmul.mubr.f32.vlgmr.msra.gmra.mrb[0].mxu1 %v182_v33  ;;  %717 = vmatprep.subr.bf16.mxu0 %v716_v60  ;;  %v879_v33 = vrot.slane %v30_v31, %v868_v13  ;;  %v199_v45 = vrot.slane %v185_v34, %v868_v13  ;;  %v154_v47 = vld [vmem:[#allocation2 + $0x3d8] sm:$0xff]  ;;  %v732_v51 = vpack.c.bf16 %v122_v43, %v121_v42  ;;  %v105_v52 = vld [vmem:[#allocation2 + $0x250] sm:$0xff]  ;;  %v124_v58 = vld [vmem:[#allocation2 + $0x2e8] sm:$0xff] }
  0x39   :  { %747 = vmatpush3.bf16.msra.mxu1 %v746_v59  ;;  %v106_v53 = vld [vmem:[#allocation2 + $0x258] sm:$0xff]  ;;  %v137_v54 = vld [vmem:[#allocation2 + $0x350] sm:$0xff]  ;;  %v764_v55 = vpack.c.bf16 %v154_v47, %v153_v46  ;;  %v155_v13 = vld [vmem:[#allocation2 + $0x3e0] sm:$0xff]  ;;  %v736_v62 = vpack.c.bf16 %v124_v58, %v123_v57 }
  0x3a   :  { %749 = vmatprep.subr.bf16.mxu1 %v748_v0  ;;  %v200_v44 = vcombine.high %v879_v33, %v879_v33  ;;  %v201_v49 = vcombine.high %v199_v45, %v199_v45  ;;  %v138_v56 = vld [vmem:[#allocation2 + $0x358] sm:$0xff]  ;;  %v156_v59 = vld [vmem:[#allocation2 + $0x3e8] sm:$0xff]  ;;  %v734_v60 = vpack.c.bf16 %v106_v53, %v105_v52  ;;  %v107_v63 = vld [vmem:[#allocation2 + $0x260] sm:$0xff] }
  0x3b   :  { %719 = vmatpush3.bf16.msra.mxu0 %v718_v6  ;;  %v766_v61 = vpack.c.bf16 %v138_v56, %v137_v54  ;;  %v108_v0 = vld [vmem:[#allocation2 + $0x268] sm:$0xff]  ;;  %v139_v1 = vld [vmem:[#allocation2 + $0x360] sm:$0xff]  ;;  %v768_v2 = vpack.c.bf16 %v156_v59, %v155_v13  ;;  %v125_v4 = vld [vmem:[#allocation2 + $0x2f0] sm:$0xff] }
  0x3c   :  { %721 = vmatprep.subr.bf16.mxu0 %v720_v8  ;;  %414 = vmatprep.mubr.f32.mxu0 %v200_v44  ;;  %v140_v3 = vld [vmem:[#allocation2 + $0x368] sm:$0xff]  ;;  %v126_v5 = vld [vmem:[#allocation2 + $0x2f8] sm:$0xff]  ;;  %v157_v6 = vld [vmem:[#allocation2 + $0x3f0] sm:$0xff]  ;;  %v738_v8 = vpack.c.bf16 %v108_v0, %v107_v63 }
  0x3d   :  { %751 = vmatpush3.bf16.msra.mxu1 %v750_v7  ;;  %484 = vmatprep.mubr.f32.mxu1 %v201_v49  ;;  %v158_v7 = vld [vmem:[#allocation2 + $0x3f8] sm:$0xff]  ;;  %v770_v9 = vpack.c.bf16 %v140_v3, %v139_v1  ;;  %v740_v10 = vpack.c.bf16 %v126_v5, %v125_v4  ;;  %v109_v11 = vld [vmem:[#allocation2 + $0x270] sm:$0xff] }
  0x3e   :  { %753 = vmatprep.subr.bf16.mxu1 %v752_v12  ;;  %v110_v12 = vld [vmem:[#allocation2 + $0x278] sm:$0xff]  ;;  %v772_v14 = vpack.c.bf16 %v158_v7, %v157_v6  ;;  %v141_v15 = vld [vmem:[#allocation2 + $0x370] sm:$0xff] }
  0x3f   :  { %723 = vmatpush3.bf16.msra.mxu0 %v722_v19  ;;  %v142_v16 = vld [vmem:[#allocation2 + $0x378] sm:$0xff]  ;;  %v742_v17 = vpack.c.bf16 %v110_v12, %v109_v11 }
  0x40   :  { %725 = vmatprep.subr.bf16.mxu0 %v724_v21  ;;  %v774_v18 = vpack.c.bf16 %v142_v16, %v141_v15 }
  0x41   :  { %755 = vmatpush3.bf16.msra.mxu1 %v754_v20  ;;  %v507_v20 = vld [vmem:[%s902_s2] ss:$0 sm:$0xff]  ;;  %s805_s2 = scalar_lea.vmem %s499_s4, 32 }
  0x42   :  { %757 = vmatprep.subr.bf16.mxu1 %v756_v25  ;;  %p806_p8 = scmp.ne.s32.totalorder %s499_s4, %s805_s2  ;;  %p811_p10 = scmp.lt.s32.totalorder %s805_s2, %s805_s2 }
  0x43   :  { %727 = vmatpush3.bf16.msra.mxu0 %v726_v32 }
  0x44   :  { %729 = vmatprep.subr.bf16.mxu0 %v728_v36  ;;  %p812_p11 = por %p811_p10, %p810_p9 }
  0x45   :  { %759 = vmatpush3.bf16.msra.mxu1 %v758_v35 }
  0x46   :  { %761 = vmatprep.subr.bf16.mxu1 %v760_v40  ;;  %p813_p12 = pnand %p812_p11, %p806_p8 }
  0x47   :  { %731 = vmatpush3.bf16.msra.mxu0 %v730_v48 }
  0x48   :  { %733 = vmatprep.subr.bf16.mxu0 %v732_v51 }
  0x49   :  { %763 = vmatpush3.bf16.msra.mxu1 %v762_v50 }
  0x4a   :  { %765 = vmatprep.subr.bf16.mxu1 %v764_v55 }
  0x4b   :  { %735 = vmatpush3.bf16.msra.mxu0 %v734_v60 }
  0x4c   :  { %737 = vmatprep.subr.bf16.mxu0 %v736_v62 }
  0x4d   :  { %767 = vmatpush3.bf16.msra.mxu1 %v766_v61 }
  0x4e   :  { %769 = vmatprep.subr.bf16.mxu1 %v768_v2 }
  0x4f   :  { %739 = vmatpush3.bf16.msra.mxu0 %v738_v8 }
  0x50   :  { %741 = vmatprep.subr.bf16.mxu0 %v740_v10 }
  0x51   :  { %771 = vmatpush3.bf16.msra.mxu1 %v770_v9 }
  0x52   :  { %773 = vmatprep.subr.bf16.mxu1 %v772_v14 }
  0x53   :  { %743 = vmatpush3.bf16.msra.mxu0 %v742_v17 }
  0x55   :  { %775 = vmatpush3.bf16.msra.mxu1 %v774_v18 }
  0x56   :  { %415 = vmatmul.mubr.f32.vlgmr.msra.gmra.mrb[2].mxu0 %v879_v33 }
  0x58   :  { %485 = vmatmul.mubr.f32.vlgmr.msra.gmra.mrb[2].mxu1 %v199_v45 }
 0x109   :  { %v540_v19 = vpop.f32.mrb[0].mxu0 }
 0x10a   :  { %v541_v21 = vpop.f32.mrb[1].mxu0 }
 0x10b   :  { %v575_v22 = vpop.f32.mrb[0].mxu1  ;;  %v542_v23 = vadd.f32 %v541_v21, %v540_v19 }
 0x10c   :  { %v576_v24 = vpop.f32.mrb[1].mxu1 }
 0x10d   :  { %v577_v25 = vadd.f32 %v576_v24, %v575_v22  ;;  %v277_v26 = vadd.f32 %v542_v23, %v507_v20 }
 0x10f   :  { %v347_v27 = vadd.f32 %v577_v25, %v277_v26 }
 0x129   :  { %v610_v28 = vpop.f32.mrb[2].mxu0 }
 0x12a   :  { %v611_v29 = vpop.f32.mrb[3].mxu0 }
 0x12b   :  { %v645_v30 = vpop.f32.mrb[2].mxu1  ;;  %v612_v31 = vadd.f32 %v611_v29, %v610_v28 }
 0x12c   :  { %v646_v32 = vpop.f32.mrb[3].mxu1 }
 0x12d   :  { %v647_v34 = vadd.f32 %v646_v32, %v645_v30  ;;  %v417_v33 = vadd.f32 %v612_v31, %v347_v27 }
 0x12f   :  { %v487_v35 = vadd.f32 %v647_v34, %v417_v33 }
 0x131   :  { %v490_v36 = vmax.f32 %v487_v35, 0.0 }
 0x133   :  { %491 = vst [vmem:[#allocation5] sm:$0x3] %v490_v36 }
 0x134   :  { %816 = shalt.err (!%p813_p12)
}
 0x135   :  { %s817_s7 = scalar_lea.hbm %s903_s3, 32 }
 0x136   :  { %p818_p13 = scmp.ne.s32.totalorder %s903_s3, %s817_s7  ;;  %p821_p0 = scmp.lt.u32.totalorder %s817_s7, %s903_s3 }
 0x138   :  { %p823_p1 = pnand %p821_p0, %p818_p13 }
 0x13a   :  { %826 = shalt.err (!%p823_p1)
}
 0x13b   :  { %501 = dma.vmem_to_hbm [thread:$0]  %s499_s4, 32, %s903_s3, [#allocation4]  }
 0x13c   :  { %829 = dma.done.wait [#allocation4], 32  }
 0x13d   :  { %830 = vsyncadd [#allocation4], 4294967264 }
 0x13e   :  { %505 = vsyncpa [#allocation3], 1 }
 0x13f   :  { %506 = vsyncpa [#allocation4], 1 }

</bundles_post_ra>
